<compile_context>
chip_gen: v7x
topology: tpu7x:2x2x1
jax: 0.10.0
libtpu: 0.0.40
codegen_flags: <defaults>
</compile_context>

<pallas_src>
import jax
import jax.numpy as jnp
from jax.experimental import pallas as pl
from jax.experimental.pallas import tpu as pltpu

_LANE = 128
_SUBLANE_BF16 = 16   # bf16 packs two rows per sublane -> keep tiles 16-row aligned


def _round_up(x, m):
    return (x + m - 1) // m * m


def _make_mlp_kernel(n_hidden_layers: int, activation: str, n_classes: int,
                     n_classes_pad: int):
    """Fused kernel: hidden linears + activation, out linear, masked log_softmax."""

    def kernel(*refs):
        # refs = (x, w1, b1, ..., wL, bL, w_out, b_out, out)
        x_ref = refs[0]
        out_ref = refs[-1]

        h = x_ref[...]                      # bf16 (TB, D_pad) — already MXU-ready
        idx = 1
        for _ in range(n_hidden_layers):
            w = refs[idx][...]              # bf16 (in_pad, out_pad), resident
            b = refs[idx + 1][...]          # f32  (1, out_pad), resident
            idx += 2
            # bf16 x bf16 matmul on the MXU, f32 accumulation; bias added once
            # (hoisted — no K-loop here, so no repeated broadcast).
            h = jnp.dot(h.astype(w.dtype), w,
                        preferred_element_type=jnp.float32) + b
            if activation == "relu":
                h = jnp.maximum(h, 0.0)
            else:  # sigmoid (validated in the wrapper) — EUP exp + reciprocal.
                h = jax.nn.sigmoid(h)
            # Dropout with p=0 (eval semantics) is the identity.
            # TODO(synk): training-mode dropout (p>0) needs pltpu.prng_* masks.

        w_out = refs[idx][...]
        b_out = refs[idx + 1][...]
        logits = jnp.dot(h.astype(w_out.dtype), w_out,
                         preferred_element_type=jnp.float32) + b_out

        # Mask padded class columns so they don't perturb the softmax denominator.
        if n_classes_pad != n_classes:
            col = jax.lax.broadcasted_iota(jnp.int32, logits.shape, 1)
            logits = jnp.where(col < n_classes, logits, -jnp.inf)

        # Numerically-stable log_softmax over the (lane-padded) class axis.
        m = jnp.max(logits, axis=-1, keepdims=True)
        lse = jnp.log(jnp.sum(jnp.exp(logits - m), axis=-1, keepdims=True)) + m
        out_ref[...] = (logits - lse).astype(out_ref.dtype)

    return kernel


def mlp_forward(x_nchw, params, *, activation="relu",
                weight_dtype=jnp.bfloat16, batch_tile=512):
    """params = [(w1, b1), ..., (wL, bL), (w_out, b_out)] with w of shape (in, out)."""
    if activation not in ("relu", "sigmoid"):
        raise ValueError(f"unsupported activation: {activation!r}")

    B = x_nchw.shape[0]
    x2d = x_nchw.reshape(B, -1).astype(jnp.float32)   # same order as torch x.view(B,-1)
    D = x2d.shape[1]

    D_pad = _round_up(D, _LANE)
    n_classes = params[-1][0].shape[1]
    C_pad = _round_up(n_classes, _LANE)

    # Batch tile: >=16 sublanes (bf16 packing), up to `batch_tile` rows; pad batch.
    TB = _round_up(min(batch_tile, _round_up(B, _SUBLANE_BF16)), _SUBLANE_BF16)
    B_pad = _round_up(B, TB)

    # Stream the activations in bf16: numerically identical to casting inside the
    # kernel (the matmul consumes bf16 either way) but halves the x HBM traffic.
    x_p = jnp.pad(x2d, ((0, B_pad - B), (0, D_pad - D))).astype(weight_dtype)

    resident = lambda i: (0, 0)   # weights/biases: same block every grid step
    flat_args = [x_p]
    in_specs = [pl.BlockSpec((TB, D_pad), lambda i: (i, 0))]

    dims_pad = [D_pad]
    prev_pad = D_pad
    for w, b in params:
        out_dim = w.shape[1]
        out_pad = _round_up(out_dim, _LANE)
        w_p = jnp.pad(w.astype(jnp.float32),
                      ((0, prev_pad - w.shape[0]), (0, out_pad - out_dim)))
        w_p = w_p.astype(weight_dtype)                 # bf16 weights: half the HBM bytes
        b_p = jnp.pad(b.astype(jnp.float32), (0, out_pad - out_dim)).reshape(1, out_pad)
        flat_args += [w_p, b_p]
        in_specs += [pl.BlockSpec((prev_pad, out_pad), resident),
                     pl.BlockSpec((1, out_pad), resident)]
        dims_pad.append(out_pad)
        prev_pad = out_pad
    # TODO(synk): for very large in_dim on v7x (64 MiB VMEM) add a K grid axis
    # ("arbitrary") with an f32 VMEM accumulator instead of full-K x/W1 tiles.

    n_hidden_layers = len(params) - 1
    kernel = _make_mlp_kernel(n_hidden_layers, activation, n_classes, C_pad)

    # Cost estimate (advisory) and VMEM sizing.
    flops = 2 * B_pad * sum(dims_pad[i] * dims_pad[i + 1] for i in range(len(dims_pad) - 1))
    transcendentals = B_pad * C_pad
    if activation == "sigmoid":
        transcendentals += B_pad * sum(dims_pad[1:-1])
    bytes_accessed = int(x_p.size * x_p.dtype.itemsize + B_pad * C_pad * 4 +
                         sum(int(a.size) * a.dtype.itemsize for a in flat_args[1:]))
    weight_bytes = sum(int(a.size) * a.dtype.itemsize for a in flat_args[1:])
    needed_vmem = (2 * (TB * D_pad * x_p.dtype.itemsize + TB * C_pad * 4)
                   + 2 * weight_bytes + (2 << 20))
    vmem_limit = int(min(max(needed_vmem, 32 << 20), 64 << 20))

    out_padded = pl.pallas_call(
        kernel,
        grid=(B_pad // TB,),
        in_specs=in_specs,
        out_specs=pl.BlockSpec((TB, C_pad), lambda i: (i, 0)),   # lane-dense store
        out_shape=jax.ShapeDtypeStruct((B_pad, C_pad), jnp.float32),
        compiler_params=pltpu.CompilerParams(
            dimension_semantics=("parallel",),      # megacore: split batch across TCs
            vmem_limit_bytes=vmem_limit),
        cost_estimate=pl.CostEstimate(flops=int(flops),
                                      transcendentals=int(transcendentals),
                                      bytes_accessed=bytes_accessed),
    )(*flat_args)

    return out_padded[:B, :n_classes]


def init_params(key, in_dim, n_hidden_nodes, n_classes=10):
    """Deterministic synthetic weights, stored as (in_features, out_features)."""
    params = []
    dims = [in_dim] + list(n_hidden_nodes) + [n_classes]
    for i in range(len(dims) - 1):
        key, kw, kb = jax.random.split(key, 3)
        bound = 1.0 / jnp.sqrt(dims[i])
        w = jax.random.uniform(kw, (dims[i], dims[i + 1]), jnp.float32, -bound, bound)
        b = jax.random.uniform(kb, (dims[i + 1],), jnp.float32, -bound, bound)
        params.append((w, b))
    return params


def _reference(x_nchw, params, activation, weight_dtype):
    """Pure-JAX reference with the same bf16-weight matmul recipe as the kernel."""
    h = x_nchw.reshape(x_nchw.shape[0], -1).astype(jnp.float32)
    for w, b in params[:-1]:
        h = jnp.dot(h.astype(weight_dtype), w.astype(weight_dtype),
                    preferred_element_type=jnp.float32) + b
        h = jnp.maximum(h, 0.0) if activation == "relu" else jax.nn.sigmoid(h)
    w, b = params[-1]
    logits = jnp.dot(h.astype(weight_dtype), w.astype(weight_dtype),
                     preferred_element_type=jnp.float32) + b
    return jax.nn.log_softmax(logits, axis=-1)


if __name__ == "__main__":
    # Module config: input_shape=(4,16,16), n_hidden_nodes=[32,32],
    # n_hidden_layers=2, activation='relu', drop_out=0 (identity).
    key = jax.random.PRNGKey(0)
    kx, kp = jax.random.split(key)

    input_shape = (4, 16, 16)
    batch = 2
    n_hidden_nodes = [32, 32]
    activation = "relu"

    x = jax.random.normal(kx, (batch,) + input_shape, dtype=jnp.float32)
    in_dim = input_shape[0] * input_shape[1] * input_shape[2]
    params = init_params(kp, in_dim, n_hidden_nodes, n_classes=10)

    out = mlp_forward(x, params, activation=activation)
    out = jax.block_until_ready(out)

    ref = _reference(x, params, activation, jnp.bfloat16)
    assert out.shape == (batch, 10), out.shape
    assert bool(jnp.allclose(out, ref, atol=5e-3, rtol=5e-3)), (
        f"max abs err = {float(jnp.max(jnp.abs(out - ref)))}")

    print("KERNEL_OK")
</pallas_src>

<mosaic_0001>
module attributes {stable_mosaic.version = 11 : i64} {
  func.func @kernel(%arg0: i32, %arg1: memref<16x1024xbf16, #tpu.memory_space<vmem>>, %arg2: memref<1024x128xbf16, #tpu.memory_space<vmem>>, %arg3: memref<1x128xf32, #tpu.memory_space<vmem>>, %arg4: memref<128x128xbf16, #tpu.memory_space<vmem>>, %arg5: memref<1x128xf32, #tpu.memory_space<vmem>>, %arg6: memref<128x128xbf16, #tpu.memory_space<vmem>>, %arg7: memref<1x128xf32, #tpu.memory_space<vmem>>, %arg8: memref<16x128xf32, #tpu.memory_space<vmem>>) attributes {dimension_semantics = [#tpu.dimension_semantics<parallel>], iteration_bounds = array<i64: 1>, scalar_prefetch = 0 : i64, scratch_operands = 0 : i64, tpu.core_type = #tpu.core_type<tc>, window_params = [{transform_indices = @transform_0, window_bounds = array<i64: 16, 1024>}, {pipeline_mode = #tpu.pipeline_mode<synchronous>, transform_indices = @transform_1, window_bounds = array<i64: 1024, 128>}, {pipeline_mode = #tpu.pipeline_mode<synchronous>, transform_indices = @transform_2, window_bounds = array<i64: 1, 128>}, {pipeline_mode = #tpu.pipeline_mode<synchronous>, transform_indices = @transform_3, window_bounds = array<i64: 128, 128>}, {pipeline_mode = #tpu.pipeline_mode<synchronous>, transform_indices = @transform_4, window_bounds = array<i64: 1, 128>}, {pipeline_mode = #tpu.pipeline_mode<synchronous>, transform_indices = @transform_5, window_bounds = array<i64: 128, 128>}, {pipeline_mode = #tpu.pipeline_mode<synchronous>, transform_indices = @transform_6, window_bounds = array<i64: 1, 128>}, {transform_indices = @transform_7, window_bounds = array<i64: 16, 128>}]} {
    %c0 = arith.constant 0 : index
    %c0_0 = arith.constant 0 : index
    %0 = vector.load %arg1[%c0, %c0_0] : memref<16x1024xbf16, #tpu.memory_space<vmem>>, vector<16x1024xbf16>
    %c0_1 = arith.constant 0 : index
    %c0_2 = arith.constant 0 : index
    %1 = vector.load %arg2[%c0_1, %c0_2] : memref<1024x128xbf16, #tpu.memory_space<vmem>>, vector<1024x128xbf16>
    %c0_3 = arith.constant 0 : index
    %c0_4 = arith.constant 0 : index
    %2 = vector.load %arg3[%c0_3, %c0_4] : memref<1x128xf32, #tpu.memory_space<vmem>>, vector<1x128xf32>
    %cst = arith.constant dense<0.000000e+00> : vector<16x128xf32>
    %3 = tpu.matmul %0, %1, %cst {dimension_numbers = #tpu.dot_dimension_numbers<[1], [0], [0], [1], [0, 0, 1, 1], [], []>} : vector<16x1024xbf16>, vector<1024x128xbf16>, vector<16x128xf32> -> vector<16x128xf32>
    %4 = vector.broadcast %2 : vector<1x128xf32> to vector<16x128xf32>
    %5 = arith.addf %3, %4 : vector<16x128xf32>
    %cst_5 = arith.constant 0.000000e+00 : f32
    %6 = vector.broadcast %cst_5 : f32 to vector<16x128xf32>
    %7 = arith.maximumf %5, %6 : vector<16x128xf32>
    %c0_6 = arith.constant 0 : index
    %c0_7 = arith.constant 0 : index
    %8 = vector.load %arg4[%c0_6, %c0_7] : memref<128x128xbf16, #tpu.memory_space<vmem>>, vector<128x128xbf16>
    %c0_8 = arith.constant 0 : index
    %c0_9 = arith.constant 0 : index
    %9 = vector.load %arg5[%c0_8, %c0_9] : memref<1x128xf32, #tpu.memory_space<vmem>>, vector<1x128xf32>
    %10 = arith.truncf %7 : vector<16x128xf32> to vector<16x128xbf16>
    %cst_10 = arith.constant dense<0.000000e+00> : vector<16x128xf32>
    %11 = tpu.matmul %10, %8, %cst_10 {dimension_numbers = #tpu.dot_dimension_numbers<[1], [0], [0], [1], [0, 0, 1, 1], [], []>} : vector<16x128xbf16>, vector<128x128xbf16>, vector<16x128xf32> -> vector<16x128xf32>
    %12 = vector.broadcast %9 : vector<1x128xf32> to vector<16x128xf32>
    %13 = arith.addf %11, %12 : vector<16x128xf32>
    %cst_11 = arith.constant 0.000000e+00 : f32
    %14 = vector.broadcast %cst_11 : f32 to vector<16x128xf32>
    %15 = arith.maximumf %13, %14 : vector<16x128xf32>
    %c0_12 = arith.constant 0 : index
    %c0_13 = arith.constant 0 : index
    %16 = vector.load %arg6[%c0_12, %c0_13] : memref<128x128xbf16, #tpu.memory_space<vmem>>, vector<128x128xbf16>
    %c0_14 = arith.constant 0 : index
    %c0_15 = arith.constant 0 : index
    %17 = vector.load %arg7[%c0_14, %c0_15] : memref<1x128xf32, #tpu.memory_space<vmem>>, vector<1x128xf32>
    %18 = arith.truncf %15 : vector<16x128xf32> to vector<16x128xbf16>
    %cst_16 = arith.constant dense<0.000000e+00> : vector<16x128xf32>
    %19 = tpu.matmul %18, %16, %cst_16 {dimension_numbers = #tpu.dot_dimension_numbers<[1], [0], [0], [1], [0, 0, 1, 1], [], []>} : vector<16x128xbf16>, vector<128x128xbf16>, vector<16x128xf32> -> vector<16x128xf32>
    %20 = vector.broadcast %17 : vector<1x128xf32> to vector<16x128xf32>
    %21 = arith.addf %19, %20 : vector<16x128xf32>
    %22 = tpu.iota {dimensions = array<i32: 1>} : vector<16x128xi32>
    %c10_i32 = arith.constant 10 : i32
    %23 = vector.broadcast %c10_i32 : i32 to vector<16x128xi32>
    %24 = arith.cmpi slt, %22, %23 : vector<16x128xi32>
    %cst_17 = arith.constant 0xFF800000 : f32
    %25 = vector.broadcast %cst_17 : f32 to vector<16x128xf32>
    %26 = arith.select %24, %21, %25 : vector<16x128xi1>, vector<16x128xf32>
    %cst_18 = arith.constant dense<0xFF800000> : vector<16xf32>
    %27 = vector.multi_reduction <maximumf>, %26, %cst_18 [1] : vector<16x128xf32> to vector<16xf32>
    %28 = vector.shape_cast %27 : vector<16xf32> to vector<16x1xf32>
    %29 = vector.broadcast %28 : vector<16x1xf32> to vector<16x128xf32>
    %30 = arith.subf %26, %29 : vector<16x128xf32>
    %31 = math.exp %30 : vector<16x128xf32>
    %cst_19 = arith.constant dense<0.000000e+00> : vector<16xf32>
    %32 = vector.multi_reduction <add>, %31, %cst_19 [1] : vector<16x128xf32> to vector<16xf32>
    %33 = vector.shape_cast %32 : vector<16xf32> to vector<16x1xf32>
    %34 = math.log %33 : vector<16x1xf32>
    %35 = arith.addf %34, %28 : vector<16x1xf32>
    %36 = vector.broadcast %35 : vector<16x1xf32> to vector<16x128xf32>
    %37 = arith.subf %26, %36 : vector<16x128xf32>
    %c0_20 = arith.constant 0 : index
    %c0_21 = arith.constant 0 : index
    %38 = vector.load %arg8[%c0_20, %c0_21] : memref<16x128xf32, #tpu.memory_space<vmem>>, vector<16x128xf32>
    tpu.vector_store %arg8[%c0_20, %c0_21], %37 {strides = array<i32>} : memref<16x128xf32, #tpu.memory_space<vmem>>, vector<16x128xf32>,
    return
  }
  func.func @transform_0(%arg0: i32) -> (i32, i32) {
    %c0_i32 = arith.constant 0 : i32
    %c0_i32_0 = arith.constant 0 : i32
    return %arg0, %c0_i32 : i32, i32
  }
  func.func @transform_1(%arg0: i32) -> (i32, i32) {
    %c0_i32 = arith.constant 0 : i32
    %c0_i32_0 = arith.constant 0 : i32
    %c0_i32_1 = arith.constant 0 : i32
    return %c0_i32, %c0_i32_0 : i32, i32
  }
  func.func @transform_2(%arg0: i32) -> (i32, i32) {
    %c0_i32 = arith.constant 0 : i32
    %c0_i32_0 = arith.constant 0 : i32
    %c0_i32_1 = arith.constant 0 : i32
    return %c0_i32, %c0_i32_0 : i32, i32
  }
  func.func @transform_3(%arg0: i32) -> (i32, i32) {
    %c0_i32 = arith.constant 0 : i32
    %c0_i32_0 = arith.constant 0 : i32
    %c0_i32_1 = arith.constant 0 : i32
    return %c0_i32, %c0_i32_0 : i32, i32
  }
  func.func @transform_4(%arg0: i32) -> (i32, i32) {
    %c0_i32 = arith.constant 0 : i32
    %c0_i32_0 = arith.constant 0 : i32
    %c0_i32_1 = arith.constant 0 : i32
    return %c0_i32, %c0_i32_0 : i32, i32
  }
  func.func @transform_5(%arg0: i32) -> (i32, i32) {
    %c0_i32 = arith.constant 0 : i32
    %c0_i32_0 = arith.constant 0 : i32
    %c0_i32_1 = arith.constant 0 : i32
    return %c0_i32, %c0_i32_0 : i32, i32
  }
  func.func @transform_6(%arg0: i32) -> (i32, i32) {
    %c0_i32 = arith.constant 0 : i32
    %c0_i32_0 = arith.constant 0 : i32
    %c0_i32_1 = arith.constant 0 : i32
    return %c0_i32, %c0_i32_0 : i32, i32
  }
  func.func @transform_7(%arg0: i32) -> (i32, i32) {
    %c0_i32 = arith.constant 0 : i32
    %c0_i32_0 = arith.constant 0 : i32
    return %arg0, %c0_i32 : i32, i32
  }
}

</mosaic_0001>

<bundles_post_ra>
// kernel: tpu_custom_call.1
= control target key start
LH: loop header
LB: loop body
LE: loop exit
PB: predicated region body
PF: predicated region fallthrough
CT: control target
= control target key end

     0   :  { %12 = vsyncpa [#allocation3], 0  ;;  %s1704_s0 = inlined_call_operand.hbm [shape: bf16[16,1024], index: 0, kind: input, shape index: {}]   ;;  %s1705_s1 = inlined_call_operand.hbm [shape: bf16[1024,128], index: 1, kind: input, shape index: {}]   ;;  %s1706_s2 = inlined_call_operand.vmem [shape: f32[1,128], index: 2, kind: input, shape index: {}]   ;;  %s1707_s3 = inlined_call_operand.hbm [shape: bf16[128,128], index: 3, kind: input, shape index: {}]   ;;  %s1708_s4 = inlined_call_operand.vmem [shape: f32[1,128], index: 4, kind: input, shape index: {}]   ;;  %s1709_s5 = inlined_call_operand.hbm [shape: bf16[128,128], index: 5, kind: input, shape index: {}]   ;;  %s1710_s6 = inlined_call_operand.vmem [shape: f32[1,128], index: 6, kind: input, shape index: {}]   ;;  %s1711_s7 = inlined_call_operand.hbm [shape: f32[16,128], index: 7, kind: output, shape index: {}]  }
   0x1   :  { %13 = vsyncpa [#allocation6], 0 }
   0x2   :  { %14 = vsyncpa [#allocation9], 0 }
   0x3   :  { %15 = vsyncpa [#allocation4], 0  ;;  %s1548_s24 = smov [#allocation5]   ;;  %s1430_s28 = scalar_lea.hbm %s1705_s1, 8192 }
   0x4   :  { %s33_s25 = sshll.u32 %s1548_s24, 4  ;;  %p1431_p0 = scmp.ne.s32.totalorder %s1705_s1, %s1430_s28  ;;  %s34_s25 = int_to_ptr.vmem [resolvable:$true] %s33_s25 }
   0x5   :  { %p1434_p1 = scmp.lt.u32.totalorder %s1430_s28, %s1705_s1 }
   0x7   :  { %p1436_p2 = pnand %p1434_p1, %p1431_p0 }
   0x9   :  { %1439 = shalt.err (!%p1436_p2)
}
   0xa   :  { %s1440_s10 = scalar_lea.vmem %s34_s25, 8192  ;;  %p1445_p4 = scmp.lt.s32.totalorder %s34_s25, %s34_s25 }
   0xb   :  { %p1441_p3 = scmp.ne.s32.totalorder %s34_s25, %s1440_s10  ;;  %p1446_p5 = scmp.lt.s32.totalorder %s1440_s10, %s1440_s10 }
   0xd   :  { %p1447_p6 = por %p1446_p5, %p1445_p4 }
   0xf   :  { %p1448_p7 = pnand %p1447_p6, %p1441_p3 }
  0x11   :  { %1451 = shalt.err (!%p1448_p7)
}
  0x12   :  { %s1549_s11 = smov 64   ;;  %s1550_s12 = smov 4  }
  0x13   :  { %39 = dma.hbm_to_vmem [thread:$0]  %s1705_s1, 8192, %s34_s25, [#allocation6], %s1549_s11, %s1549_s11, %s1550_s12  }
  0x14   :  { %s1551_s15 = smov [#allocation2]   ;;  %s1452_s19 = scalar_lea.hbm %s1704_s0, 1024 }
  0x15   :  { %s21_s16 = sshll.u32 %s1551_s15, 4  ;;  %p1453_p8 = scmp.ne.s32.totalorder %s1704_s0, %s1452_s19  ;;  %s22_s16 = int_to_ptr.vmem [resolvable:$true] %s21_s16 }
  0x16   :  { %p1456_p9 = scmp.lt.u32.totalorder %s1452_s19, %s1704_s0 }
  0x18   :  { %p1458_p10 = pnand %p1456_p9, %p1453_p8 }
  0x1a   :  { %1461 = shalt.err (!%p1458_p10)
}
  0x1b   :  { %s1462_s24 = scalar_lea.vmem %s22_s16, 1024  ;;  %p1467_p12 = scmp.lt.s32.totalorder %s22_s16, %s22_s16 }
  0x1c   :  { %p1463_p11 = scmp.ne.s32.totalorder %s22_s16, %s1462_s24  ;;  %p1468_p13 = scmp.lt.s32.totalorder %s1462_s24, %s1462_s24 }
  0x1e   :  { %p1469_p0 = por %p1468_p13, %p1467_p12 }
  0x20   :  { %p1470_p1 = pnand %p1469_p0, %p1463_p11 }
  0x22   :  { %1473 = shalt.err (!%p1470_p1)
}
  0x23   :  { %s1552_s1 = smov 512   ;;  %s1553_s25 = smov 32  }
  0x24   :  { %27 = dma.hbm_to_vmem [thread:$0]  %s1704_s0, 1024, %s22_s16, [#allocation3], %s1552_s1, %s1552_s1, %s1553_s25  }
  0x25   :  { %s1554_s28 = smov [#allocation7]   ;;  %s1555_s30 = smov [#allocation8]  }
  0x26   :  { %s47_s29 = sshll.u32 %s1554_s28, 4  ;;  %s61_s8 = sshll.u32 %s1555_s30, 4  ;;  %s48_s29 = int_to_ptr.vmem [resolvable:$true] %s47_s29  ;;  %s1628_s8 = int_to_ptr.vmem [resolvable:$true] %s61_s8 }
  0x27   :  { %s1474_s13 = scalar_lea.hbm %s1707_s3, 1024 }
  0x28   :  { %p1475_p2 = scmp.ne.s32.totalorder %s1707_s3, %s1474_s13  ;;  %p1478_p3 = scmp.lt.u32.totalorder %s1474_s13, %s1707_s3 }
  0x2a   :  { %p1480_p4 = pnand %p1478_p3, %p1475_p2 }
  0x2c   :  { %1483 = shalt.err (!%p1480_p4)
}
  0x2d   :  { %s1484_s0 = scalar_lea.vmem %s48_s29, 1024  ;;  %p1489_p6 = scmp.lt.s32.totalorder %s48_s29, %s48_s29 }
  0x2e   :  { %p1485_p5 = scmp.ne.s32.totalorder %s48_s29, %s1484_s0  ;;  %p1490_p7 = scmp.lt.s32.totalorder %s1484_s0, %s1484_s0 }
  0x30   :  { %p1491_p8 = por %p1490_p7, %p1489_p6 }
  0x32   :  { %p1492_p9 = pnand %p1491_p8, %p1485_p5 }
  0x34   :  { %1495 = shalt.err (!%p1492_p9)
}
  0x35   :  { %53 = dma.hbm_to_vmem [thread:$0]  %s1707_s3, 1024, %s48_s29, [#allocation6], %s1549_s11, %s1549_s11, %s1550_s12  }
  0x36   :  { %s1496_s22 = scalar_lea.hbm %s1709_s5, 1024 }
  0x37   :  { %p1497_p10 = scmp.ne.s32.totalorder %s1709_s5, %s1496_s22  ;;  %p1500_p11 = scmp.lt.u32.totalorder %s1496_s22, %s1709_s5 }
  0x39   :  { %p1502_p12 = pnand %p1500_p11, %p1497_p10 }
  0x3b   :  { %1505 = shalt.err (!%p1502_p12)
}
  0x3c   :  { %s1506_s26 = scalar_lea.vmem %s1628_s8, 1024  ;;  %p1511_p0 = scmp.lt.s32.totalorder %s1628_s8, %s1628_s8 }
  0x3d   :  { %p1507_p13 = scmp.ne.s32.totalorder %s1628_s8, %s1506_s26  ;;  %p1512_p1 = scmp.lt.s32.totalorder %s1506_s26, %s1506_s26 }
  0x3f   :  { %p1513_p2 = por %p1512_p1, %p1511_p0 }
  0x41   :  { %p1514_p3 = pnand %p1513_p2, %p1507_p13 }
  0x43   :  { %1517 = shalt.err (!%p1514_p3)
}
  0x44   :  { %67 = dma.hbm_to_vmem [thread:$0]  %s1709_s5, 1024, %s1628_s8, [#allocation9], %s1549_s11, %s1549_s11, %s1550_s12  }
  0x45   :  { %1540 = dma.done.wait [#allocation3], 1024  }
  0x46   :  { %1541 = vsyncadd [#allocation3], 4294966272 }
  0x47   :  { %1542 = dma.done.wait [#allocation6], 9216  }
  0x48   :  { %1543 = vsyncadd [#allocation6], 4294958080 }
  0x49   :  { %1544 = dma.done.wait [#allocation9], 1024  }
  0x4a   :  { %1545 = vsyncadd [#allocation9], 4294966272  ;;  %v1342_v0 = vld [vmem:[#allocation5 + $0x40] sm:$0xff]   ;;  %v1346_v4 = vld [vmem:[#allocation5 + $0x48] sm:$0xff]   ;;  %vm1557_vm0 = vmmov 0  }
  0x4b   :  { %v1343_v1 = vld [vmem:[#allocation5 + $0xc0] sm:$0xff]   ;;  %1183 = vmatprep.subr.bf16.mxu0 %v1342_v0  ;;  %v1347_v5 = vld [vmem:[#allocation5 + $0xc8] sm:$0xff]   ;;  %v1350_v8 = vld [vmem:[#allocation5 + $0x50] sm:$0xff]  }
  0x4c   :  { %v1344_v2 = vld [vmem:[#allocation5] sm:$0xff]   ;;  %1205 = vmatprep.subr.bf16.mxu1 %v1343_v1  ;;  %v1348_v6 = vld [vmem:[#allocation5 + $0x8] sm:$0xff]   ;;  %v1351_v9 = vld [vmem:[#allocation5 + $0xd0] sm:$0xff]  }
  0x4d   :  { %v1345_v3 = vld [vmem:[#allocation5 + $0x80] sm:$0xff]   ;;  %1184 = vmatpush3.bf16.msra.mxu0 %v1344_v2  ;;  %v1349_v7 = vld [vmem:[#allocation5 + $0x88] sm:$0xff]   ;;  %v1352_v10 = vld [vmem:[#allocation5 + $0x10] sm:$0xff]  }
  0x4e   :  { %1206 = vmatpush3.bf16.msra.mxu1 %v1345_v3  ;;  %1185 = vmatprep.subr.bf16.mxu0 %v1346_v4  ;;  %v1353_v11 = vld [vmem:[#allocation5 + $0x90] sm:$0xff]   ;;  %v1354_v12 = vld [vmem:[#allocation5 + $0x58] sm:$0xff]   ;;  %v1358_v16 = vld [vmem:[#allocation5 + $0x60] sm:$0xff]  }
  0x4f   :  { %1207 = vmatprep.subr.bf16.mxu1 %v1347_v5  ;;  %v1355_v13 = vld [vmem:[#allocation5 + $0xd8] sm:$0xff]   ;;  %v1359_v17 = vld [vmem:[#allocation5 + $0xe0] sm:$0xff]   ;;  %v1362_v20 = vld [vmem:[#allocation5 + $0x68] sm:$0xff]  }
  0x50   :  { %v1356_v14 = vld [vmem:[#allocation5 + $0x18] sm:$0xff]   ;;  %v1360_v18 = vld [vmem:[#allocation5 + $0x20] sm:$0xff]   ;;  %v1363_v21 = vld [vmem:[#allocation5 + $0xe8] sm:$0xff]  }
  0x51   :  { %1186 = vmatpush3.bf16.msra.mxu0 %v1348_v6  ;;  %v1357_v15 = vld [vmem:[#allocation5 + $0x98] sm:$0xff]   ;;  %v1361_v19 = vld [vmem:[#allocation5 + $0xa0] sm:$0xff]   ;;  %v1364_v22 = vld [vmem:[#allocation5 + $0x28] sm:$0xff]  }
  0x52   :  { %1208 = vmatpush3.bf16.msra.mxu1 %v1349_v7  ;;  %1187 = vmatprep.subr.bf16.mxu0 %v1350_v8  ;;  %v1365_v23 = vld [vmem:[#allocation5 + $0xa8] sm:$0xff]   ;;  %v1366_v24 = vld [vmem:[#allocation5 + $0x70] sm:$0xff]   ;;  %v1370_v28 = vld [vmem:[#allocation5 + $0x78] sm:$0xff]  }
  0x53   :  { %1209 = vmatprep.subr.bf16.mxu1 %v1351_v9  ;;  %v1367_v25 = vld [vmem:[#allocation5 + $0xf0] sm:$0xff]   ;;  %v1371_v29 = vld [vmem:[#allocation5 + $0xf8] sm:$0xff]   ;;  %v83_v32 = vld [vmem:[#allocation2] sm:$0xff] }
  0x54   :  { %v1368_v26 = vld [vmem:[#allocation5 + $0x30] sm:$0xff]   ;;  %v1372_v30 = vld [vmem:[#allocation5 + $0x38] sm:$0xff]   ;;  %v87_v33 = vld [vmem:[#allocation2 + $0x20] sm:$0xff] }
  0x55   :  { %1188 = vmatpush3.bf16.msra.mxu0 %v1352_v10  ;;  %v1369_v27 = vld [vmem:[#allocation5 + $0xb0] sm:$0xff]   ;;  %v1373_v31 = vld [vmem:[#allocation5 + $0xb8] sm:$0xff]   ;;  %v84_v34 = vld [vmem:[#allocation2 + $0x8] sm:$0xff]  ;;  %v1093_v35 = vcombine.low %v83_v32, %v87_v33  ;;  %v1094_v36 = vcombine.high %v83_v32, %v87_v33 }
  0x56   :  { %1210 = vmatpush3.bf16.msra.mxu1 %v1353_v11  ;;  %1189 = vmatprep.subr.bf16.mxu0 %v1354_v12  ;;  %v88_v37 = vld [vmem:[#allocation2 + $0x28] sm:$0xff]  ;;  %v1374_v40 = vld [vmem:[#allocation5 + $0x140] sm:$0xff]   ;;  %v1382_v48 = vld [vmem:[#allocation5 + $0x150] sm:$0xff]  }
  0x57   :  { %1211 = vmatprep.subr.bf16.mxu1 %v1355_v13  ;;  %v1095_v38 = vcombine.low %v84_v34, %v88_v37  ;;  %v1096_v39 = vcombine.high %v84_v34, %v88_v37  ;;  %682 = vmatprep.mubr.bf16.mxu0 %v1094_v36  ;;  %v1375_v41 = vld [vmem:[#allocation5 + $0x1c0] sm:$0xff]   ;;  %v1378_v44 = vld [vmem:[#allocation5 + $0x148] sm:$0xff]   ;;  %v1383_v49 = vld [vmem:[#allocation5 + $0x1d0] sm:$0xff]  }
  0x58   :  { %v1376_v42 = vld [vmem:[#allocation5 + $0x100] sm:$0xff]   ;;  %v1379_v45 = vld [vmem:[#allocation5 + $0x1c8] sm:$0xff]   ;;  %v1384_v50 = vld [vmem:[#allocation5 + $0x110] sm:$0xff]  }
  0x59   :  { %1190 = vmatpush3.bf16.msra.mxu0 %v1356_v14  ;;  %723 = vmatprep.mubr.bf16.mxu1 %v1096_v39  ;;  %v1377_v43 = vld [vmem:[#allocation5 + $0x180] sm:$0xff]   ;;  %v1380_v46 = vld [vmem:[#allocation5 + $0x108] sm:$0xff]   ;;  %v1385_v51 = vld [vmem:[#allocation5 + $0x190] sm:$0xff]  }
  0x5a   :  { %1212 = vmatpush3.bf16.msra.mxu1 %v1357_v15  ;;  %1191 = vmatprep.subr.bf16.mxu0 %v1358_v16  ;;  %v1381_v47 = vld [vmem:[#allocation5 + $0x188] sm:$0xff]   ;;  %v1386_v52 = vld [vmem:[#allocation5 + $0x158] sm:$0xff]   ;;  %v1390_v56 = vld [vmem:[#allocation5 + $0x160] sm:$0xff]  }
  0x5b   :  { %1213 = vmatprep.subr.bf16.mxu1 %v1359_v17  ;;  %v1387_v53 = vld [vmem:[#allocation5 + $0x1d8] sm:$0xff]   ;;  %v1391_v57 = vld [vmem:[#allocation5 + $0x1e0] sm:$0xff]   ;;  %v1394_v60 = vld [vmem:[#allocation5 + $0x168] sm:$0xff]   ;;  %v1556_v17 = vmov 0.0  }
  0x5c   :  { %v1388_v54 = vld [vmem:[#allocation5 + $0x118] sm:$0xff]   ;;  %v1392_v58 = vld [vmem:[#allocation5 + $0x120] sm:$0xff]   ;;  %v1395_v61 = vld [vmem:[#allocation5 + $0x1e8] sm:$0xff]  }
  0x5d   :  { %1192 = vmatpush3.bf16.msra.mxu0 %v1360_v18  ;;  %v1389_v55 = vld [vmem:[#allocation5 + $0x198] sm:$0xff]   ;;  %v1393_v59 = vld [vmem:[#allocation5 + $0x1a0] sm:$0xff]   ;;  %v1396_v62 = vld [vmem:[#allocation5 + $0x128] sm:$0xff]  }
  0x5e   :  { %1214 = vmatpush3.bf16.msra.mxu1 %v1361_v19  ;;  %1193 = vmatprep.subr.bf16.mxu0 %v1362_v20  ;;  %v1397_v63 = vld [vmem:[#allocation5 + $0x1a8] sm:$0xff]   ;;  %v1398_v0 = vld [vmem:[#allocation5 + $0x170] sm:$0xff]   ;;  %v1402_v4 = vld [vmem:[#allocation5 + $0x178] sm:$0xff]  }
  0x5f   :  { %1215 = vmatprep.subr.bf16.mxu1 %v1363_v21  ;;  %v1399_v1 = vld [vmem:[#allocation5 + $0x1f0] sm:$0xff]   ;;  %v1403_v5 = vld [vmem:[#allocation5 + $0x1f8] sm:$0xff]   ;;  %v1406_v16 = vld [vmem:[#allocation7] sm:$0xff]  }
  0x60   :  { %v1400_v2 = vld [vmem:[#allocation5 + $0x130] sm:$0xff]   ;;  %v1404_v6 = vld [vmem:[#allocation5 + $0x138] sm:$0xff]   ;;  %v1407_v18 = vld [vmem:[#allocation7 + $0x8] sm:$0xff]  }
  0x61   :  { %1194 = vmatpush3.bf16.msra.mxu0 %v1364_v22  ;;  %v1401_v3 = vld [vmem:[#allocation5 + $0x1b0] sm:$0xff]   ;;  %v1405_v7 = vld [vmem:[#allocation5 + $0x1b8] sm:$0xff]   ;;  %v1410_v21 = vld [vmem:[#allocation7 + $0x20] sm:$0xff]  }
  0x62   :  { %1216 = vmatpush3.bf16.msra.mxu1 %v1365_v23  ;;  %1195 = vmatprep.subr.bf16.mxu0 %v1366_v24  ;;  %v85_v8 = vld [vmem:[#allocation2 + $0x10] sm:$0xff]  ;;  %v86_v12 = vld [vmem:[#allocation2 + $0x18] sm:$0xff]  ;;  %v1411_v22 = vld [vmem:[#allocation7 + $0x28] sm:$0xff]  }
  0x63   :  { %1217 = vmatprep.subr.bf16.mxu1 %v1367_v25  ;;  %v89_v9 = vld [vmem:[#allocation2 + $0x30] sm:$0xff]  ;;  %v90_v13 = vld [vmem:[#allocation2 + $0x38] sm:$0xff]  ;;  %v1414_v25 = vld [vmem:[#allocation8] sm:$0xff]  }
  0x64   :  { %v1097_v10 = vcombine.low %v85_v8, %v89_v9  ;;  %v1098_v11 = vcombine.high %v85_v8, %v89_v9  ;;  %v1099_v14 = vcombine.low %v86_v12, %v90_v13  ;;  %v1100_v15 = vcombine.high %v86_v12, %v90_v13  ;;  %v1408_v19 = vld [vmem:[#allocation7 + $0x10] sm:$0xff]   ;;  %v1409_v20 = vld [vmem:[#allocation7 + $0x18] sm:$0xff]   ;;  %v1092_v33 = vld [vmem:[%s1706_s2] ss:$0 sm:$0xff] }
  0x65   :  { %1196 = vmatpush3.bf16.msra.mxu0 %v1368_v26  ;;  %v1412_v23 = vld [vmem:[#allocation7 + $0x30] sm:$0xff]   ;;  %v1413_v24 = vld [vmem:[#allocation7 + $0x38] sm:$0xff]   ;;  %v1415_v26 = vld [vmem:[#allocation8 + $0x8] sm:$0xff]  }
  0x66   :  { %1218 = vmatpush3.bf16.msra.mxu1 %v1369_v27  ;;  %1197 = vmatprep.subr.bf16.mxu0 %v1370_v28  ;;  %v1416_v27 = vld [vmem:[#allocation8 + $0x10] sm:$0xff]   ;;  %v1417_v28 = vld [vmem:[#allocation8 + $0x18] sm:$0xff]  }
  0x67   :  { %1219 = vmatprep.subr.bf16.mxu1 %v1371_v29  ;;  %v1418_v29 = vld [vmem:[#allocation8 + $0x20] sm:$0xff]  }
  0x69   :  { %1198 = vmatpush3.bf16.msra.mxu0 %v1372_v30  ;;  %v1419_v30 = vld [vmem:[#allocation8 + $0x28] sm:$0xff]  }
  0x6a   :  { %1220 = vmatpush3.bf16.msra.mxu1 %v1373_v31  ;;  %1227 = vmatprep.subr.bf16.mxu0 %v1374_v40 }
  0x6b   :  { %1249 = vmatprep.subr.bf16.mxu1 %v1375_v41 }
  0x6c   :  { %683 = vmatmul.mubr.bf16.vlgmr.msra.gmra.mrb[0].mxu0 %v1093_v35 }
  0x6d   :  { %724 = vmatmul.mubr.bf16.vlgmr.msra.gmra.mrb[0].mxu1 %v1095_v38  ;;  %1228 = vmatpush3.bf16.msra.mxu0 %v1376_v42 }
  0x6e   :  { %1250 = vmatpush3.bf16.msra.mxu1 %v1377_v43  ;;  %1229 = vmatprep.subr.bf16.mxu0 %v1378_v44 }
  0x6f   :  { %1251 = vmatprep.subr.bf16.mxu1 %v1379_v45  ;;  %764 = vmatprep.mubr.bf16.mxu0 %v1098_v11 }
  0x70   :  { %805 = vmatprep.mubr.bf16.mxu1 %v1100_v15  ;;  %v1044_v15 = vlaneseq }
  0x71   :  { %1230 = vmatpush3.bf16.msra.mxu0 %v1380_v46 }
  0x72   :  { %1252 = vmatpush3.bf16.msra.mxu1 %v1381_v47  ;;  %1231 = vmatprep.subr.bf16.mxu0 %v1382_v48 }
  0x73   :  { %1253 = vmatprep.subr.bf16.mxu1 %v1383_v49 }
  0x75   :  { %1232 = vmatpush3.bf16.msra.mxu0 %v1384_v50 }
  0x76   :  { %1254 = vmatpush3.bf16.msra.mxu1 %v1385_v51  ;;  %1233 = vmatprep.subr.bf16.mxu0 %v1386_v52 }
  0x77   :  { %1255 = vmatprep.subr.bf16.mxu1 %v1387_v53 }
  0x79   :  { %1234 = vmatpush3.bf16.msra.mxu0 %v1388_v54 }
  0x7a   :  { %1256 = vmatpush3.bf16.msra.mxu1 %v1389_v55  ;;  %1235 = vmatprep.subr.bf16.mxu0 %v1390_v56 }
  0x7b   :  { %1257 = vmatprep.subr.bf16.mxu1 %v1391_v57 }
  0x7d   :  { %1236 = vmatpush3.bf16.msra.mxu0 %v1392_v58 }
  0x7e   :  { %1258 = vmatpush3.bf16.msra.mxu1 %v1393_v59  ;;  %1237 = vmatprep.subr.bf16.mxu0 %v1394_v60 }
  0x7f   :  { %1259 = vmatprep.subr.bf16.mxu1 %v1395_v61 }
  0x81   :  { %1238 = vmatpush3.bf16.msra.mxu0 %v1396_v62 }
  0x82   :  { %1260 = vmatpush3.bf16.msra.mxu1 %v1397_v63  ;;  %1239 = vmatprep.subr.bf16.mxu0 %v1398_v0 }
  0x83   :  { %1261 = vmatprep.subr.bf16.mxu1 %v1399_v1 }
  0x85   :  { %1240 = vmatpush3.bf16.msra.mxu0 %v1400_v2 }
  0x86   :  { %1262 = vmatpush3.bf16.msra.mxu1 %v1401_v3  ;;  %1241 = vmatprep.subr.bf16.mxu0 %v1402_v4  ;;  %v1420_v3 = vld [vmem:[#allocation8 + $0x30] sm:$0xff]   ;;  %v1421_v4 = vld [vmem:[#allocation8 + $0x38] sm:$0xff]  }
  0x87   :  { %1263 = vmatprep.subr.bf16.mxu1 %v1403_v5  ;;  %v1165_v5 = vld [vmem:[%s1708_s4] ss:$0 sm:$0xff]  ;;  %s1558_s4 = smov [#allocation10]  }
  0x89   :  { %1242 = vmatpush3.bf16.msra.mxu0 %v1404_v6 }
  0x8a   :  { %1264 = vmatpush3.bf16.msra.mxu1 %v1405_v7  ;;  %1289 = vmatprep.subr.bf16.mxu0 %v1556_v17 }
  0x8b   :  { %1309 = vmatprep.subr.bf16.mxu1 %v1556_v17 }
  0x8c   :  { %765 = vmatmul.mubr.bf16.vlgmr.msra.gmra.mrb[4].mxu0 %v1097_v10 }
  0x8d   :  { %806 = vmatmul.mubr.bf16.vlgmr.msra.gmra.mrb[4].mxu1 %v1099_v14  ;;  %1290 = vmatpush3.bf16.msra.mxu0 %v1406_v16  ;;  %v1045_v16 = vand.u32 127, %v1044_v15 }
  0x8e   :  { %1291 = vmatprep.subr.bf16.mxu0 %v1556_v17  ;;  %1305 = vmatprep.mubr.msk.bf16.mxu0 %vm1557_vm0, %v1556_v17 }
  0x8f   :  { %1325 = vmatprep.mubr.msk.bf16.mxu1 %vm1557_vm0, %v1556_v17  ;;  %1310 = vmatpush3.bf16.msra.mxu1 %v1414_v25  ;;  %vm1046_vm1 = vcmp.lt.s32.totalorder %v1045_v16, 10 }
  0x90   :  { %1311 = vmatprep.subr.bf16.mxu1 %v1556_v17 }
  0x91   :  { %1292 = vmatpush3.bf16.msra.mxu0 %v1407_v18 }
  0x92   :  { %1293 = vmatprep.subr.bf16.mxu0 %v1556_v17 }
  0x93   :  { %1312 = vmatpush3.bf16.msra.mxu1 %v1415_v26 }
  0x94   :  { %1313 = vmatprep.subr.bf16.mxu1 %v1556_v17 }
  0x95   :  { %1294 = vmatpush3.bf16.msra.mxu0 %v1408_v19 }
  0x96   :  { %1295 = vmatprep.subr.bf16.mxu0 %v1556_v17 }
  0x97   :  { %1314 = vmatpush3.bf16.msra.mxu1 %v1416_v27 }
  0x98   :  { %1315 = vmatprep.subr.bf16.mxu1 %v1556_v17 }
  0x99   :  { %1296 = vmatpush3.bf16.msra.mxu0 %v1409_v20 }
  0x9a   :  { %1297 = vmatprep.subr.bf16.mxu0 %v1556_v17 }
  0x9b   :  { %1316 = vmatpush3.bf16.msra.mxu1 %v1417_v28 }
  0x9c   :  { %1317 = vmatprep.subr.bf16.mxu1 %v1556_v17 }
  0x9d   :  { %1298 = vmatpush3.bf16.msra.mxu0 %v1410_v21 }
  0x9e   :  { %1299 = vmatprep.subr.bf16.mxu0 %v1556_v17 }
  0x9f   :  { %1318 = vmatpush3.bf16.msra.mxu1 %v1418_v29 }
  0xa0   :  { %1319 = vmatprep.subr.bf16.mxu1 %v1556_v17 }
  0xa1   :  { %1300 = vmatpush3.bf16.msra.mxu0 %v1411_v22 }
  0xa2   :  { %1301 = vmatprep.subr.bf16.mxu0 %v1556_v17 }
  0xa3   :  { %1320 = vmatpush3.bf16.msra.mxu1 %v1419_v30 }
  0xa4   :  { %1321 = vmatprep.subr.bf16.mxu1 %v1556_v17 }
  0xa5   :  { %1302 = vmatpush3.bf16.msra.mxu0 %v1412_v23 }
  0xa6   :  { %1303 = vmatprep.subr.bf16.mxu0 %v1556_v17 }
  0xa7   :  { %1322 = vmatpush3.bf16.msra.mxu1 %v1420_v3 }
  0xa8   :  { %1323 = vmatprep.subr.bf16.mxu1 %v1556_v17  ;;  %v1174_v17 = vld [vmem:[%s1710_s6] ss:$0 sm:$0xff]  ;;  %s1078_s6 = sshll.u32 %s1558_s4, 4  ;;  %s1079_s6 = int_to_ptr.vmem [resolvable:$true] %s1078_s6 }
  0xa9   :  { %1304 = vmatpush3.bf16.msra.mxu0 %v1413_v24  ;;  %s1518_s30 = scalar_lea.vmem %s1079_s6, 256  ;;  %p1523_p5 = scmp.lt.s32.totalorder %s1079_s6, %s1079_s6 }
  0xaa   :  { %p1519_p4 = scmp.ne.s32.totalorder %s1079_s6, %s1518_s30  ;;  %p1524_p6 = scmp.lt.s32.totalorder %s1518_s30, %s1518_s30 }
  0xab   :  { %1324 = vmatpush3.bf16.msra.mxu1 %v1421_v4 }
  0xac   :  { %p1525_p7 = por %p1524_p6, %p1523_p5 }
  0xae   :  { %p1526_p8 = pnand %p1525_p7, %p1519_p4 }
 0x13f   :  { %v1199_v31 = vpop.f32.mrb[0].mxu0 }
 0x140   :  { %v1221_v32 = vpop.f32.mrb[0].mxu1  ;;  %v1200_v34 = vpop.f32.mrb[1].mxu0 }
 0x141   :  { %v1201_v35 = vadd.f32 %v1200_v34, %v1199_v31  ;;  %v1222_v36 = vpop.f32.mrb[1].mxu1  ;;  %v1202_v37 = vpop.f32.mrb[2].mxu0 }
 0x142   :  { %v1223_v38 = vadd.f32 %v1222_v36, %v1221_v32  ;;  %v1224_v39 = vpop.f32.mrb[2].mxu1  ;;  %v1203_v40 = vpop.f32.mrb[3].mxu0 }
 0x143   :  { %v685_v41 = vadd.f32 %v1201_v35, %v1092_v33  ;;  %v1204_v42 = vadd.f32 %v1203_v40, %v1202_v37  ;;  %v1225_v43 = vpop.f32.mrb[3].mxu1 }
 0x144   :  { %v1226_v44 = vadd.f32 %v1225_v43, %v1224_v39 }
 0x145   :  { %v726_v45 = vadd.f32 %v1223_v38, %v685_v41  ;;  %v688_v46 = vadd.f32 %v1204_v42, %v1092_v33 }
 0x147   :  { %v729_v47 = vadd.f32 %v1226_v44, %v688_v46 }
 0x15f   :  { %v1243_v48 = vpop.f32.mrb[4].mxu0 }
 0x160   :  { %v1265_v49 = vpop.f32.mrb[4].mxu1  ;;  %v1244_v50 = vpop.f32.mrb[5].mxu0 }
 0x161   :  { %v1245_v51 = vadd.f32 %v1244_v50, %v1243_v48  ;;  %v1266_v52 = vpop.f32.mrb[5].mxu1  ;;  %v1246_v53 = vpop.f32.mrb[6].mxu0 }
 0x162   :  { %v1267_v54 = vadd.f32 %v1266_v52, %v1265_v49  ;;  %v1268_v55 = vpop.f32.mrb[6].mxu1  ;;  %v1247_v56 = vpop.f32.mrb[7].mxu0 }
 0x163   :  { %v767_v57 = vadd.f32 %v1245_v51, %v726_v45  ;;  %v1248_v58 = vadd.f32 %v1247_v56, %v1246_v53  ;;  %v1269_v59 = vpop.f32.mrb[7].mxu1 }
 0x164   :  { %v1270_v60 = vadd.f32 %v1269_v59, %v1268_v55 }
 0x165   :  { %v808_v61 = vadd.f32 %v1267_v54, %v767_v57  ;;  %v770_v62 = vadd.f32 %v1248_v58, %v729_v47 }
 0x167   :  { %v811_v63 = vadd.f32 %v1270_v60, %v770_v62  ;;  %v814_v0 = vmax.f32 %v808_v61, 0.0 }
 0x169   :  { %v815_v1 = vmax.f32 %v811_v63, 0.0 }
 0x16b   :  { %v833_v2 = vpack.c.bf16 %v815_v1, %v814_v0 }
 0x16d   :  { %1306 = vmatmul.mubr.bf16.vlgmr.msra.gmra.mrb[8].mxu0 %v833_v2 }
 0x240   :  { %v922_v6 = vpop.f32.mrb[8].mxu0 }
 0x241   :  { %v923_v7 = vadd.f32 %v1165_v5, %v922_v6  ;;  %v1307_v8 = vpop.f32.mrb[9].mxu0 }
 0x242   :  { %v925_v9 = vpop.f32.mrb[10].mxu0 }
 0x243   :  { %v926_v10 = vadd.f32 %v1165_v5, %v925_v9  ;;  %v1308_v11 = vpop.f32.mrb[11].mxu0  ;;  %v929_v12 = vmax.f32 %v923_v7, 0.0 }
 0x245   :  { %v930_v13 = vmax.f32 %v926_v10, 0.0 }
 0x247   :  { %v948_v14 = vpack.c.bf16 %v930_v13, %v929_v12 }
 0x249   :  { %1326 = vmatmul.mubr.bf16.vlgmr.msra.gmra.mrb[8].mxu1 %v948_v14 }
 0x31c   :  { %v1037_v18 = vpop.f32.mrb[8].mxu1 }
 0x31d   :  { %v1038_v19 = vadd.f32 %v1174_v17, %v1037_v18  ;;  %v1327_v20 = vpop.f32.mrb[9].mxu1 }
 0x31e   :  { %v1040_v21 = vpop.f32.mrb[10].mxu1 }
 0x31f   :  { %v1041_v22 = vadd.f32 %v1174_v17, %v1040_v21  ;;  %v1328_v23 = vpop.f32.mrb[11].mxu1  ;;  %v1047_v24 = vsel %vm1046_vm1, %v1038_v19, -inf }
 0x320   :  { %1049 = vmax.xlane.f32.xlu0 %v1047_v24 }
 0x321   :  { %v1048_v25 = vsel %vm1046_vm1, %v1041_v22, -inf }
 0x324   :  { %1051 = vmax.xlane.f32.xlu0 %v1048_v25 }
 0x3ad   :  { %v1050_v26 = vpop.xlane.xlu0 %1049 }
 0x3ae   :  { %v1053_v27 = vsub.f32 %v1047_v24, %v1050_v26 }
 0x3b0   :  { %v1055_v28 = vmul.f32 1.442695, %v1053_v27 }
 0x3b1   :  { %v1052_v29 = vpop.xlane.xlu0 %1051 }
 0x3b2   :  { %v1054_v30 = vsub.f32 %v1048_v25, %v1052_v29  ;;  %1422 = vpow2.f32 %v1055_v28 }
 0x3b4   :  { %v1057_v31 = vmul.f32 1.442695, %v1054_v30 }
 0x3b6   :  { %1424 = vpow2.f32 %v1057_v31 }
 0x3bc   :  { %v1423_v32 = vpop.eup %1422 }
 0x3bd   :  { %1059 = vadd.xlane.f32.xlu1 %v1423_v32 }
 0x3c0   :  { %v1425_v33 = vpop.eup %1424 }
 0x3c1   :  { %1061 = vadd.xlane.f32.xlu1 %v1425_v33 }
 0x44a   :  { %v1060_v34 = vpop.xlane.xlu1 %1059 }
 0x44b   :  { %1426 = vlog2.f32 %v1060_v34 }
 0x44e   :  { %v1062_v35 = vpop.xlane.xlu1 %1061 }
 0x44f   :  { %1428 = vlog2.f32 %v1062_v35 }
 0x455   :  { %v1427_v36 = vpop.eup %1426 }
 0x456   :  { %v1064_v37 = vmul.f32 0.6931472, %v1427_v36 }
 0x458   :  { %v1067_v38 = vadd.f32 %v1064_v37, %v1050_v26 }
 0x459   :  { %v1429_v39 = vpop.eup %1428 }
 0x45a   :  { %v1069_v40 = vsub.f32 %v1047_v24, %v1067_v38  ;;  %v1066_v41 = vmul.f32 0.6931472, %v1429_v39 }
 0x45c   :  { %1071 = vst [vmem:[#allocation10] sm:$0xff] %v1069_v40  ;;  %v1068_v42 = vadd.f32 %v1066_v41, %v1052_v29 }
 0x45e   :  { %v1070_v43 = vsub.f32 %v1048_v25, %v1068_v42 }
 0x460   :  { %1072 = vst [vmem:[#allocation10 + $0x8] sm:$0xff] %v1070_v43 }
 0x461   :  { %1529 = shalt.err (!%p1526_p8)
}
 0x462   :  { %s1530_s10 = scalar_lea.hbm %s1711_s7, 256 }
 0x463   :  { %p1531_p9 = scmp.ne.s32.totalorder %s1711_s7, %s1530_s10  ;;  %p1534_p10 = scmp.lt.u32.totalorder %s1530_s10, %s1711_s7 }
 0x465   :  { %p1536_p11 = pnand %p1534_p10, %p1531_p9 }
 0x467   :  { %1539 = shalt.err (!%p1536_p11)
}
 0x468   :  { %s1559_s18 = smov 128   ;;  %s1560_s0 = smov 8  }
 0x469   :  { %1084 = dma.vmem_to_hbm [thread:$0]  %s1079_s6, 256, %s1711_s7, [#allocation4], %s1559_s18, %s1559_s18, %s1560_s0  }
 0x46a   :  { %1546 = dma.done.wait [#allocation4], 256  }
 0x46b   :  { %1547 = vsyncadd [#allocation4], 4294967040 }
 0x46c   :  { %1088 = vsyncpa [#allocation3], 1 }
 0x46d   :  { %1089 = vsyncpa [#allocation6], 1 }
 0x46e   :  { %1090 = vsyncpa [#allocation9], 1 }
 0x46f   :  { %1091 = vsyncpa [#allocation4], 1 }

</bundles_post_ra>
